<compile_context>
chip_gen: v7x
topology: tpu7x:2x2x1
jax: 0.10.0
libtpu: 0.0.40
codegen_flags: <defaults>
</compile_context>

<pallas_src>
import functools
import math

import jax
import jax.numpy as jnp
from jax import lax
from jax.experimental import pallas as pl
from jax.experimental.pallas import tpu as pltpu


NEG_INF = -1e30  # large-negative mask fill: avoids any inf-inf NaN edge case


# ---------------------------------------------------------------------------
# Kernel 1: fused QKV projection.
#   qkv[b, row_tile, col_tile] = x[b, row_tile, :] @ W_qkv[:, col_tile]
# ---------------------------------------------------------------------------
def _qkv_proj_kernel(x_ref, w_ref, qkv_ref):
    qkv_ref[0] = jnp.dot(
        x_ref[0], w_ref[...], preferred_element_type=jnp.float32
    ).astype(qkv_ref.dtype)


# ---------------------------------------------------------------------------
# Kernel 2: causal flash attention + fused W_o projection.
#   q_ref, k_ref, v_ref : (1, H, block, d_k)   compute dtype
#   wo_ref              : (H, d_k, D)          compute dtype
#   o_ref               : (1, block_q, D)      output dtype (lane-dense slab)
#   m/l/acc scratch     : (H, block_q, {1,1,d_k}) f32, persistent across KV axis
# ---------------------------------------------------------------------------
def _flash_attn_kernel(q_ref, k_ref, v_ref, wo_ref, o_ref, m_sc, l_sc, acc_sc):
    qi = pl.program_id(1)
    ki = pl.program_id(2)
    block_q = q_ref.shape[2]
    block_k = k_ref.shape[2]

    @pl.when(ki == 0)
    def _init():
        m_sc[...] = jnp.full(m_sc.shape, NEG_INF, m_sc.dtype)
        l_sc[...] = jnp.zeros(l_sc.shape, l_sc.dtype)
        acc_sc[...] = jnp.zeros(acc_sc.shape, acc_sc.dtype)

    # Causal tile skip: the KV tile is entirely above the diagonal iff its
    # first key index exceeds the last query index of this q tile.  Skipping
    # it roughly halves the attention FLOPs for causal masks.
    @pl.when(ki * block_k <= (qi + 1) * block_q - 1)
    def _compute():
        q = q_ref[0]                       # (H, bq, dk), compute dtype
        k = k_ref[0]                       # (H, bk, dk)
        v = v_ref[0]                       # (H, bk, dk)

        # Batched over heads; K consumed in its native layout (no explicit
        # transpose).  1/sqrt(d_k) is already folded into W_q.
        s = lax.dot_general(
            q, k,
            dimension_numbers=(((2,), (2,)), ((0,), (0,))),
            preferred_element_type=jnp.float32)            # (H, bq, bk) f32

        # In-tile causal mask.
        rows = lax.broadcasted_iota(jnp.int32, (block_q, block_k), 0) + qi * block_q
        cols = lax.broadcasted_iota(jnp.int32, (block_q, block_k), 1) + ki * block_k
        s = jnp.where((rows >= cols)[None, :, :], s, NEG_INF)

        # Online-softmax update; all softmax math stays f32 (VPU/EUP).
        m_prev = m_sc[...]                                  # (H, bq, 1)
        m_new = jnp.maximum(m_prev, s.max(axis=-1, keepdims=True))
        alpha = jnp.exp(m_prev - m_new)
        p = jnp.exp(s - m_new)                              # (H, bq, bk) f32
        l_sc[...] = alpha * l_sc[...] + p.sum(axis=-1, keepdims=True)
        pv = lax.dot_general(
            p.astype(v.dtype), v,
            dimension_numbers=(((2,), (1,)), ((0,), (0,))),
            preferred_element_type=jnp.float32)             # (H, bq, dk) f32
        acc_sc[...] = alpha * acc_sc[...] + pv
        m_sc[...] = m_new

    @pl.when(ki == pl.num_programs(2) - 1)
    def _finalize():
        inv_l = pl.reciprocal(l_sc[...], approx=True)        # EUP, (H, bq, 1)
        attn = (acc_sc[...] * inv_l).astype(wo_ref.dtype)    # (H, bq, dk)
        # Fused output projection: sum_h attn_h @ Wo_h -> (bq, D), stored as
        # one lane-dense slab (no per-head partial stores).
        proj = lax.dot_general(
            attn, wo_ref[...],
            dimension_numbers=(((2,), (1,)), ((0,), (0,))),
            preferred_element_type=jnp.float32)              # (H, bq, D)
        o_ref[0] = jnp.sum(proj, axis=0).astype(o_ref.dtype)


# ---------------------------------------------------------------------------
# Wrapper
# ---------------------------------------------------------------------------
def _pick_block(dim, target, align):
    """Largest divisor of `dim` that is a multiple of `align` and <= target,
    else the full dim (a full-extent block is always a legal BlockSpec)."""
    start = min(target, dim)
    start -= start % align
    for cand in range(start, align - 1, -align):
        if dim % cand == 0:
            return cand
    return dim


def _vmem_limit(est_bytes):
    # Explicit scoped-VMEM budget (defaults: 16 MiB v5e / 32 MiB v6e,v7x);
    # capped at 64 MiB so the same value is valid on v7x's smaller VMEM.
    return int(min(max(est_bytes + (4 << 20), 32 << 20), 64 << 20))


def multi_head_self_attention(x, wq, wk, wv, wo, *, num_heads,
                              compute_dtype=jnp.bfloat16,
                              block_q=256, block_k=256, block_rows=256):
    """Causal MHSA matching the PyTorch module's eval-mode forward.

    x: (B, S, D).  wq/wk/wv/wo: (D, D) PyTorch Linear layout (out, in).
    block_q/block_k = 256 targets the v6e/v7x 256-wide MXU; use 128 on v5e.
    """
    B, S, D = x.shape
    assert D % num_heads == 0
    d_k = D // num_heads
    out_dtype = x.dtype
    cs = jnp.dtype(compute_dtype).itemsize
    osz = jnp.dtype(out_dtype).itemsize

    # PyTorch Linear computes x @ W.T -> pre-transpose to (in, out), fuse the
    # three projections into one (D, 3D) weight, fold 1/sqrt(d_k) into W_q,
    # and reshape W_o into per-head panels (H, d_k, D).
    scale = 1.0 / math.sqrt(d_k)
    w_qkv = jnp.concatenate(
        [wq.T * scale, wk.T, wv.T], axis=1).astype(compute_dtype)   # (D, 3D)
    wo3 = wo.T.reshape(num_heads, d_k, D).astype(compute_dtype)     # (H, dk, D)
    x_c = x.astype(compute_dtype)

    bp = _pick_block(S, block_rows, 8)       # projection row tile
    bn = _pick_block(3 * D, 1024, 128)       # projection column tile (lane-dense)
    bq = _pick_block(S, block_q, 8)          # attention query tile
    bk = _pick_block(S, block_k, 8)          # attention key/value tile

    # ---- Kernel 1: fused QKV projection -> (B, S, 3D) ----
    est1 = 2 * bp * D * cs + 2 * D * bn * cs + 2 * bp * bn * cs
    qkv = pl.pallas_call(
        _qkv_proj_kernel,
        out_shape=jax.ShapeDtypeStruct((B, S, 3 * D), compute_dtype),
        grid_spec=pltpu.PrefetchScalarGridSpec(
            num_scalar_prefetch=0,
            grid=(B, S // bp, (3 * D) // bn),
            in_specs=[
                pl.BlockSpec((1, bp, D), lambda b, i, j: (b, i, 0)),
                pl.BlockSpec((D, bn), lambda b, i, j: (0, j)),
            ],
            out_specs=pl.BlockSpec((1, bp, bn), lambda b, i, j: (b, i, j)),
        ),
        compiler_params=pltpu.CompilerParams(
            dimension_semantics=("parallel", "parallel", "parallel"),
            vmem_limit_bytes=_vmem_limit(est1)),
    )(x_c, w_qkv)

    # Layout plumbing (XLA, outside the kernels): split heads once so the
    # attention kernel sees (B, H, S, d_k) blocks and never reshapes in-kernel.
    def split_heads(t):
        return t.reshape(B, S, num_heads, d_k).transpose(0, 2, 1, 3)

    q = split_heads(qkv[..., 0 * D:1 * D])
    k = split_heads(qkv[..., 1 * D:2 * D])
    v = split_heads(qkv[..., 2 * D:3 * D])

    # ---- Kernel 2: flash attention + fused W_o projection ----
    est2 = (2 * bq * D * cs + 4 * bk * D * cs + 2 * D * D * cs
            + 2 * bq * D * osz + num_heads * bq * (d_k + 2) * 4)
    out = pl.pallas_call(
        _flash_attn_kernel,
        out_shape=jax.ShapeDtypeStruct((B, S, D), out_dtype),
        grid_spec=pltpu.PrefetchScalarGridSpec(
            num_scalar_prefetch=0,
            grid=(B, S // bq, S // bk),
            in_specs=[
                pl.BlockSpec((1, num_heads, bq, d_k),
                             lambda b, qi, ki: (b, 0, qi, 0)),
                pl.BlockSpec((1, num_heads, bk, d_k),
                             lambda b, qi, ki: (b, 0, ki, 0)),
                pl.BlockSpec((1, num_heads, bk, d_k),
                             lambda b, qi, ki: (b, 0, ki, 0)),
                pl.BlockSpec((num_heads, d_k, D),
                             lambda b, qi, ki: (0, 0, 0)),
            ],
            out_specs=pl.BlockSpec((1, bq, D), lambda b, qi, ki: (b, qi, 0)),
            scratch_shapes=[
                pltpu.VMEM((num_heads, bq, 1), jnp.float32),     # running max
                pltpu.VMEM((num_heads, bq, 1), jnp.float32),     # running sum
                pltpu.VMEM((num_heads, bq, d_k), jnp.float32),   # accumulator
            ]),
        compiler_params=pltpu.CompilerParams(
            dimension_semantics=("parallel", "parallel", "arbitrary"),
            vmem_limit_bytes=_vmem_limit(est2)),
    )(q, k, v, wo3)
    return out


# ---------------------------------------------------------------------------
# Pure-JAX reference mirroring the PyTorch forward (eval mode).
# ---------------------------------------------------------------------------
def _reference(x, wq, wk, wv, wo, *, num_heads):
    B, S, D = x.shape
    d_k = D // num_heads
    q = (x @ wq.T).reshape(B, S, num_heads, d_k).transpose(0, 2, 1, 3)
    k = (x @ wk.T).reshape(B, S, num_heads, d_k).transpose(0, 2, 1, 3)
    v = (x @ wv.T).reshape(B, S, num_heads, d_k).transpose(0, 2, 1, 3)
    scores = jnp.einsum('bhqd,bhkd->bhqk', q, k) / math.sqrt(d_k)
    mask = jnp.tril(jnp.ones((S, S), dtype=bool))
    scores = jnp.where(mask[None, None], scores, -jnp.inf)
    attn = jax.nn.softmax(scores, axis=-1)
    out = jnp.einsum('bhqk,bhkd->bhqd', attn, v)
    out = out.transpose(0, 2, 1, 3).reshape(B, S, D)
    return out @ wo.T


if __name__ == "__main__":
    B, S, D, H = 2, 8, 32, 4

    key = jax.random.PRNGKey(0)
    kx, kq, kk, kv, ko = jax.random.split(key, 5)

    x = jax.random.normal(kx, (B, S, D), dtype=jnp.float32)
    bound = 1.0 / math.sqrt(D)   # PyTorch Linear default init range
    wq = jax.random.uniform(kq, (D, D), jnp.float32, -bound, bound)
    wk = jax.random.uniform(kk, (D, D), jnp.float32, -bound, bound)
    wv = jax.random.uniform(kv, (D, D), jnp.float32, -bound, bound)
    wo = jax.random.uniform(ko, (D, D), jnp.float32, -bound, bound)

    ref = _reference(x, wq, wk, wv, wo, num_heads=H)

    # f32 compute path (v5e-style; tight numerical check).
    mhsa_f32 = jax.jit(functools.partial(
        multi_head_self_attention, num_heads=H, compute_dtype=jnp.float32))
    out_f32 = jax.block_until_ready(mhsa_f32(x, wq, wk, wv, wo))
    assert out_f32.shape == (B, S, D)
    assert jnp.allclose(out_f32, ref, atol=2e-3, rtol=2e-3), "f32 kernel mismatch"

    # bf16 compute path (default; v6e/v7x MXU-friendly, f32 accumulation).
    mhsa_bf16 = jax.jit(functools.partial(
        multi_head_self_attention, num_heads=H, compute_dtype=jnp.bfloat16))
    out_bf16 = jax.block_until_ready(mhsa_bf16(x, wq, wk, wv, wo))
    assert out_bf16.shape == (B, S, D)
    assert jnp.allclose(out_bf16, ref, atol=5e-2, rtol=5e-2), "bf16 kernel mismatch"

    print("KERNEL_OK")
</pallas_src>

<mosaic_0001>
module attributes {stable_mosaic.version = 11 : i64} {
  func.func @_qkv_proj_kernel(%arg0: i32, %arg1: i32, %arg2: i32, %arg3: memref<1x8x32xf32, #tpu.memory_space<vmem>>, %arg4: memref<32x96xf32, #tpu.memory_space<vmem>>, %arg5: memref<1x8x96xf32, #tpu.memory_space<vmem>>) attributes {dimension_semantics = [#tpu.dimension_semantics<parallel>, #tpu.dimension_semantics<parallel>, #tpu.dimension_semantics<parallel>], iteration_bounds = array<i64: 2, 1, 1>, scalar_prefetch = 0 : i64, scratch_operands = 0 : i64, tpu.core_type = #tpu.core_type<tc>, window_params = [{transform_indices = @transform_0, window_bounds = array<i64: 1, 8, 32>}, {transform_indices = @transform_1, window_bounds = array<i64: 32, 96>}, {transform_indices = @transform_2, window_bounds = array<i64: 1, 8, 96>}]} {
    %c0 = arith.constant 0 : index
    %c0_0 = arith.constant 0 : index
    %c0_1 = arith.constant 0 : index
    %0 = vector.load %arg3[%c0, %c0_0, %c0_1] : memref<1x8x32xf32, #tpu.memory_space<vmem>>, vector<1x8x32xf32>
    %1 = vector.shape_cast %0 : vector<1x8x32xf32> to vector<8x32xf32>
    %c0_2 = arith.constant 0 : index
    %c0_3 = arith.constant 0 : index
    %2 = vector.load %arg4[%c0_2, %c0_3] : memref<32x96xf32, #tpu.memory_space<vmem>>, vector<32x96xf32>
    %cst = arith.constant dense<0.000000e+00> : vector<8x96xf32>
    %3 = tpu.matmul %1, %2, %cst {dimension_numbers = #tpu.dot_dimension_numbers<[1], [0], [0], [1], [0, 0, 1, 1], [], []>} : vector<8x32xf32>, vector<32x96xf32>, vector<8x96xf32> -> vector<8x96xf32>
    %c0_4 = arith.constant 0 : index
    %c0_5 = arith.constant 0 : index
    %c0_6 = arith.constant 0 : index
    %4 = vector.load %arg5[%c0_4, %c0_5, %c0_6] : memref<1x8x96xf32, #tpu.memory_space<vmem>>, vector<1x8x96xf32>
    %5 = vector.shape_cast %4 : vector<1x8x96xf32> to vector<8x96xf32>
    %6 = vector.shape_cast %3 : vector<8x96xf32> to vector<1x8x96xf32>
    tpu.vector_store %arg5[%c0_4, %c0_5, %c0_6], %6 {strides = array<i32>} : memref<1x8x96xf32, #tpu.memory_space<vmem>>, vector<1x8x96xf32>,
    return
  }
  func.func @transform_0(%arg0: i32, %arg1: i32, %arg2: i32) -> (i32, i32, i32) {
    %c0_i32 = arith.constant 0 : i32
    %c0_i32_0 = arith.constant 0 : i32
    return %arg0, %arg1, %c0_i32 : i32, i32, i32
  }
  func.func @transform_1(%arg0: i32, %arg1: i32, %arg2: i32) -> (i32, i32) {
    %c0_i32 = arith.constant 0 : i32
    %c0_i32_0 = arith.constant 0 : i32
    return %c0_i32, %arg2 : i32, i32
  }
  func.func @transform_2(%arg0: i32, %arg1: i32, %arg2: i32) -> (i32, i32, i32) {
    %c0_i32 = arith.constant 0 : i32
    return %arg0, %arg1, %arg2 : i32, i32, i32
  }
}

module attributes {stable_mosaic.version = 11 : i64} {
  func.func @_flash_attn_kernel(%arg0: i32, %arg1: i32, %arg2: i32, %arg3: memref<1x4x8x8xf32, #tpu.memory_space<vmem>>, %arg4: memref<1x4x8x8xf32, #tpu.memory_space<vmem>>, %arg5: memref<1x4x8x8xf32, #tpu.memory_space<vmem>>, %arg6: memref<4x8x32xf32, #tpu.memory_space<vmem>>, %arg7: memref<1x8x32xf32, #tpu.memory_space<vmem>>, %arg8: memref<4x8x1xf32, #tpu.memory_space<vmem>>, %arg9: memref<4x8x1xf32, #tpu.memory_space<vmem>>, %arg10: memref<4x8x8xf32, #tpu.memory_space<vmem>>) attributes {dimension_semantics = [#tpu.dimension_semantics<parallel>, #tpu.dimension_semantics<parallel>, #tpu.dimension_semantics<arbitrary>], iteration_bounds = array<i64: 2, 1, 1>, scalar_prefetch = 0 : i64, scratch_operands = 3 : i64, tpu.core_type = #tpu.core_type<tc>, window_params = [{transform_indices = @transform_0, window_bounds = array<i64: 1, 4, 8, 8>}, {transform_indices = @transform_1, window_bounds = array<i64: 1, 4, 8, 8>}, {transform_indices = @transform_2, window_bounds = array<i64: 1, 4, 8, 8>}, {pipeline_mode = #tpu.pipeline_mode<synchronous>, transform_indices = @transform_3, window_bounds = array<i64: 4, 8, 32>}, {transform_indices = @transform_4, window_bounds = array<i64: 1, 8, 32>}]} {
    %c0_i32 = arith.constant 0 : i32
    %0 = arith.cmpi eq, %arg2, %c0_i32 : i32
    %1 = arith.extui %0 : i1 to i32
    %c0_i32_0 = arith.constant 0 : i32
    %2 = arith.cmpi ne, %1, %c0_i32_0 : i32
    scf.if %2 {
      %cst = arith.constant -1.000000e+30 : f32
      %13 = vector.broadcast %cst : f32 to vector<4x8x1xf32>
      %c0 = arith.constant 0 : index
      %c0_6 = arith.constant 0 : index
      %c0_7 = arith.constant 0 : index
      %14 = vector.load %arg8[%c0, %c0_6, %c0_7] : memref<4x8x1xf32, #tpu.memory_space<vmem>>, vector<4x8x1xf32>
      tpu.vector_store %arg8[%c0, %c0_6, %c0_7], %13 {strides = array<i32>} : memref<4x8x1xf32, #tpu.memory_space<vmem>>, vector<4x8x1xf32>,
      %cst_8 = arith.constant 0.000000e+00 : f32
      %15 = vector.broadcast %cst_8 : f32 to vector<4x8x1xf32>
      %c0_9 = arith.constant 0 : index
      %c0_10 = arith.constant 0 : index
      %c0_11 = arith.constant 0 : index
      %16 = vector.load %arg9[%c0_9, %c0_10, %c0_11] : memref<4x8x1xf32, #tpu.memory_space<vmem>>, vector<4x8x1xf32>
      tpu.vector_store %arg9[%c0_9, %c0_10, %c0_11], %15 {strides = array<i32>} : memref<4x8x1xf32, #tpu.memory_space<vmem>>, vector<4x8x1xf32>,
      %cst_12 = arith.constant 0.000000e+00 : f32
      %17 = vector.broadcast %cst_12 : f32 to vector<4x8x8xf32>
      %c0_13 = arith.constant 0 : index
      %c0_14 = arith.constant 0 : index
      %c0_15 = arith.constant 0 : index
      %18 = vector.load %arg10[%c0_13, %c0_14, %c0_15] : memref<4x8x8xf32, #tpu.memory_space<vmem>>, vector<4x8x8xf32>
      tpu.vector_store %arg10[%c0_13, %c0_14, %c0_15], %17 {strides = array<i32>} : memref<4x8x8xf32, #tpu.memory_space<vmem>>, vector<4x8x8xf32>,
    } else {
    }
    %c8_i32 = arith.constant 8 : i32
    %3 = arith.muli %arg2, %c8_i32 : i32
    %c1_i32 = arith.constant 1 : i32
    %4 = arith.addi %arg1, %c1_i32 : i32
    %c8_i32_1 = arith.constant 8 : i32
    %5 = arith.muli %4, %c8_i32_1 : i32
    %c1_i32_2 = arith.constant 1 : i32
    %6 = arith.subi %5, %c1_i32_2 : i32
    %7 = arith.cmpi sle, %3, %6 : i32
    %8 = arith.extui %7 : i1 to i32
    %c0_i32_3 = arith.constant 0 : i32
    %9 = arith.cmpi ne, %8, %c0_i32_3 : i32
    scf.if %9 {
      %c0 = arith.constant 0 : index
      %c0_6 = arith.constant 0 : index
      %c0_7 = arith.constant 0 : index
      %c0_8 = arith.constant 0 : index
      %13 = vector.load %arg3[%c0, %c0_6, %c0_7, %c0_8] : memref<1x4x8x8xf32, #tpu.memory_space<vmem>>, vector<1x4x8x8xf32>
      %14 = vector.shape_cast %13 : vector<1x4x8x8xf32> to vector<4x8x8xf32>
      %c0_9 = arith.constant 0 : index
      %c0_10 = arith.constant 0 : index
      %c0_11 = arith.constant 0 : index
      %c0_12 = arith.constant 0 : index
      %15 = vector.load %arg4[%c0_9, %c0_10, %c0_11, %c0_12] : memref<1x4x8x8xf32, #tpu.memory_space<vmem>>, vector<1x4x8x8xf32>
      %16 = vector.shape_cast %15 : vector<1x4x8x8xf32> to vector<4x8x8xf32>
      %c0_13 = arith.constant 0 : index
      %c0_14 = arith.constant 0 : index
      %c0_15 = arith.constant 0 : index
      %c0_16 = arith.constant 0 : index
      %17 = vector.load %arg5[%c0_13, %c0_14, %c0_15, %c0_16] : memref<1x4x8x8xf32, #tpu.memory_space<vmem>>, vector<1x4x8x8xf32>
      %18 = vector.shape_cast %17 : vector<1x4x8x8xf32> to vector<4x8x8xf32>
      %cst = arith.constant dense<0.000000e+00> : vector<4x8x8xf32>
      %19 = tpu.matmul %14, %16, %cst {dimension_numbers = #tpu.dot_dimension_numbers<[2], [2], [1], [1], [0, 0, 0, 1, 1, 1], [0], [0]>} : vector<4x8x8xf32>, vector<4x8x8xf32>, vector<4x8x8xf32> -> vector<4x8x8xf32>
      %20 = tpu.iota {dimensions = array<i32: 0>} : vector<8x8xi32>
      %c8_i32_17 = arith.constant 8 : i32
      %21 = arith.muli %arg1, %c8_i32_17 : i32
      %22 = vector.broadcast %21 : i32 to vector<8x8xi32>
      %23 = arith.addi %20, %22 : vector<8x8xi32>
      %24 = tpu.iota {dimensions = array<i32: 1>} : vector<8x8xi32>
      %c8_i32_18 = arith.constant 8 : i32
      %25 = arith.muli %arg2, %c8_i32_18 : i32
      %26 = vector.broadcast %25 : i32 to vector<8x8xi32>
      %27 = arith.addi %24, %26 : vector<8x8xi32>
      %28 = arith.cmpi sge, %23, %27 : vector<8x8xi32>
      %29 = vector.shape_cast %28 : vector<8x8xi1> to vector<1x8x8xi1>
      %cst_19 = arith.constant -1.000000e+30 : f32
      %30 = vector.shape_cast %29 : vector<1x8x8xi1> to vector<1x8x8xi1>
      %31 = vector.broadcast %30 : vector<1x8x8xi1> to vector<4x8x8xi1>
      %32 = vector.broadcast %cst_19 : f32 to vector<4x8x8xf32>
      %33 = arith.select %31, %19, %32 : vector<4x8x8xi1>, vector<4x8x8xf32>
      %c0_20 = arith.constant 0 : index
      %c0_21 = arith.constant 0 : index
      %c0_22 = arith.constant 0 : index
      %34 = vector.load %arg8[%c0_20, %c0_21, %c0_22] : memref<4x8x1xf32, #tpu.memory_space<vmem>>, vector<4x8x1xf32>
      %cst_23 = arith.constant dense<0xFF800000> : vector<4x8xf32>
      %35 = vector.multi_reduction <maximumf>, %33, %cst_23 [2] : vector<4x8x8xf32> to vector<4x8xf32>
      %36 = vector.shape_cast %35 : vector<4x8xf32> to vector<4x8x1xf32>
      %37 = arith.maximumf %34, %36 : vector<4x8x1xf32>
      %38 = arith.subf %34, %37 : vector<4x8x1xf32>
      %39 = math.exp %38 : vector<4x8x1xf32>
      %40 = vector.broadcast %37 : vector<4x8x1xf32> to vector<4x8x8xf32>
      %41 = arith.subf %33, %40 : vector<4x8x8xf32>
      %42 = math.exp %41 : vector<4x8x8xf32>
      %c0_24 = arith.constant 0 : index
      %c0_25 = arith.constant 0 : index
      %c0_26 = arith.constant 0 : index
      %43 = vector.load %arg9[%c0_24, %c0_25, %c0_26] : memref<4x8x1xf32, #tpu.memory_space<vmem>>, vector<4x8x1xf32>
      %44 = arith.mulf %39, %43 : vector<4x8x1xf32>
      %cst_27 = arith.constant dense<0.000000e+00> : vector<4x8xf32>
      %45 = vector.multi_reduction <add>, %42, %cst_27 [2] : vector<4x8x8xf32> to vector<4x8xf32>
      %46 = vector.shape_cast %45 : vector<4x8xf32> to vector<4x8x1xf32>
      %47 = arith.addf %44, %46 : vector<4x8x1xf32>
      %c0_28 = arith.constant 0 : index
      %c0_29 = arith.constant 0 : index
      %c0_30 = arith.constant 0 : index
      %48 = vector.load %arg9[%c0_28, %c0_29, %c0_30] : memref<4x8x1xf32, #tpu.memory_space<vmem>>, vector<4x8x1xf32>
      tpu.vector_store %arg9[%c0_28, %c0_29, %c0_30], %47 {strides = array<i32>} : memref<4x8x1xf32, #tpu.memory_space<vmem>>, vector<4x8x1xf32>,
      %cst_31 = arith.constant dense<0.000000e+00> : vector<4x8x8xf32>
      %49 = tpu.matmul %42, %18, %cst_31 {dimension_numbers = #tpu.dot_dimension_numbers<[2], [1], [1], [2], [0, 0, 0, 1, 1, 2], [0], [0]>} : vector<4x8x8xf32>, vector<4x8x8xf32>, vector<4x8x8xf32> -> vector<4x8x8xf32>
      %c0_32 = arith.constant 0 : index
      %c0_33 = arith.constant 0 : index
      %c0_34 = arith.constant 0 : index
      %50 = vector.load %arg10[%c0_32, %c0_33, %c0_34] : memref<4x8x8xf32, #tpu.memory_space<vmem>>, vector<4x8x8xf32>
      %51 = vector.broadcast %39 : vector<4x8x1xf32> to vector<4x8x8xf32>
      %52 = arith.mulf %51, %50 : vector<4x8x8xf32>
      %53 = arith.addf %52, %49 : vector<4x8x8xf32>
      %c0_35 = arith.constant 0 : index
      %c0_36 = arith.constant 0 : index
      %c0_37 = arith.constant 0 : index
      %54 = vector.load %arg10[%c0_35, %c0_36, %c0_37] : memref<4x8x8xf32, #tpu.memory_space<vmem>>, vector<4x8x8xf32>
      tpu.vector_store %arg10[%c0_35, %c0_36, %c0_37], %53 {strides = array<i32>} : memref<4x8x8xf32, #tpu.memory_space<vmem>>, vector<4x8x8xf32>,
      %c0_38 = arith.constant 0 : index
      %c0_39 = arith.constant 0 : index
      %c0_40 = arith.constant 0 : index
      %55 = vector.load %arg8[%c0_38, %c0_39, %c0_40] : memref<4x8x1xf32, #tpu.memory_space<vmem>>, vector<4x8x1xf32>
      tpu.vector_store %arg8[%c0_38, %c0_39, %c0_40], %37 {strides = array<i32>} : memref<4x8x1xf32, #tpu.memory_space<vmem>>, vector<4x8x1xf32>,
    } else {
    }
    %c0_i32_4 = arith.constant 0 : i32
    %10 = arith.cmpi eq, %arg2, %c0_i32_4 : i32
    %11 = arith.extui %10 : i1 to i32
    %c0_i32_5 = arith.constant 0 : i32
    %12 = arith.cmpi ne, %11, %c0_i32_5 : i32
    scf.if %12 {
      %c0 = arith.constant 0 : index
      %c0_6 = arith.constant 0 : index
      %c0_7 = arith.constant 0 : index
      %13 = vector.load %arg9[%c0, %c0_6, %c0_7] : memref<4x8x1xf32, #tpu.memory_space<vmem>>, vector<4x8x1xf32>
      %14 = tpu.reciprocal %13 {approx = true} : vector<4x8x1xf32> -> vector<4x8x1xf32>
      %c0_8 = arith.constant 0 : index
      %c0_9 = arith.constant 0 : index
      %c0_10 = arith.constant 0 : index
      %15 = vector.load %arg10[%c0_8, %c0_9, %c0_10] : memref<4x8x8xf32, #tpu.memory_space<vmem>>, vector<4x8x8xf32>
      %16 = vector.broadcast %14 : vector<4x8x1xf32> to vector<4x8x8xf32>
      %17 = arith.mulf %15, %16 : vector<4x8x8xf32>
      %c0_11 = arith.constant 0 : index
      %c0_12 = arith.constant 0 : index
      %c0_13 = arith.constant 0 : index
      %18 = vector.load %arg6[%c0_11, %c0_12, %c0_13] : memref<4x8x32xf32, #tpu.memory_space<vmem>>, vector<4x8x32xf32>
      %cst = arith.constant dense<0.000000e+00> : vector<4x8x32xf32>
      %19 = tpu.matmul %17, %18, %cst {dimension_numbers = #tpu.dot_dimension_numbers<[2], [1], [1], [2], [0, 0, 0, 1, 1, 2], [0], [0]>} : vector<4x8x8xf32>, vector<4x8x32xf32>, vector<4x8x32xf32> -> vector<4x8x32xf32>
      %cst_14 = arith.constant dense<0.000000e+00> : vector<8x32xf32>
      %20 = vector.multi_reduction <add>, %19, %cst_14 [0] : vector<4x8x32xf32> to vector<8x32xf32>
      %c0_15 = arith.constant 0 : index
      %c0_16 = arith.constant 0 : index
      %c0_17 = arith.constant 0 : index
      %21 = vector.load %arg7[%c0_15, %c0_16, %c0_17] : memref<1x8x32xf32, #tpu.memory_space<vmem>>, vector<1x8x32xf32>
      %22 = vector.shape_cast %21 : vector<1x8x32xf32> to vector<8x32xf32>
      %23 = vector.shape_cast %20 : vector<8x32xf32> to vector<1x8x32xf32>
      tpu.vector_store %arg7[%c0_15, %c0_16, %c0_17], %23 {strides = array<i32>} : memref<1x8x32xf32, #tpu.memory_space<vmem>>, vector<1x8x32xf32>,
    } else {
    }
    return
  }
  func.func @transform_0(%arg0: i32, %arg1: i32, %arg2: i32) -> (i32, i32, i32, i32) {
    %c0_i32 = arith.constant 0 : i32
    %c0_i32_0 = arith.constant 0 : i32
    %c0_i32_1 = arith.constant 0 : i32
    return %arg0, %c0_i32, %arg1, %c0_i32_0 : i32, i32, i32, i32
  }
  func.func @transform_1(%arg0: i32, %arg1: i32, %arg2: i32) -> (i32, i32, i32, i32) {
    %c0_i32 = arith.constant 0 : i32
    %c0_i32_0 = arith.constant 0 : i32
    %c0_i32_1 = arith.constant 0 : i32
    return %arg0, %c0_i32, %arg2, %c0_i32_0 : i32, i32, i32, i32
  }
  func.func @transform_2(%arg0: i32, %arg1: i32, %arg2: i32) -> (i32, i32, i32, i32) {
    %c0_i32 = arith.constant 0 : i32
    %c0_i32_0 = arith.constant 0 : i32
    %c0_i32_1 = arith.constant 0 : i32
    return %arg0, %c0_i32, %arg2, %c0_i32_0 : i32, i32, i32, i32
  }
  func.func @transform_3(%arg0: i32, %arg1: i32, %arg2: i32) -> (i32, i32, i32) {
    %c0_i32 = arith.constant 0 : i32
    %c0_i32_0 = arith.constant 0 : i32
    %c0_i32_1 = arith.constant 0 : i32
    %c0_i32_2 = arith.constant 0 : i32
    return %c0_i32, %c0_i32_0, %c0_i32_1 : i32, i32, i32
  }
  func.func @transform_4(%arg0: i32, %arg1: i32, %arg2: i32) -> (i32, i32, i32) {
    %c0_i32 = arith.constant 0 : i32
    %c0_i32_0 = arith.constant 0 : i32
    return %arg0, %arg1, %c0_i32 : i32, i32, i32
  }
}

</mosaic_0001>

<bundles_post_ra>
// kernel: multi_head_self_attention.2
= control target key start
LH: loop header
LB: loop body
LE: loop exit
PB: predicated region body
PF: predicated region fallthrough
CT: control target
= control target key end

     0   :  { %s488_s9 = smov 0   ;;  %s490_s10 = smov 0   ;;  %s533_s0 = inlined_call_operand.vmem [shape: f32[2,8,32], index: 0, kind: input, shape index: {}]   ;;  %s534_s1 = inlined_call_operand.vmem [shape: f32[32,96], index: 1, kind: input, shape index: {}]   ;;  %s535_s2 = inlined_call_operand.vmem [shape: f32[2,8,96], index: 2, kind: output, shape index: {}]  }
   0x1   :  { %s492_s11 = smov 0  }
   0x2 LB: > { %s31_s12 = sadd.s32 1, %s464_s10  ;;  %p391_p0 = scmp.ge.s32.totalorder %s468_s11, 1  ;;  %s468_s11 = sphi %s492_s11, %s12_s11   ;;  %s464_s10 = sphi %s490_s10, %s537_s10   ;;  %s460_s9 = sphi %s488_s9, %s536_s9  }
   0x3   : > { %p33_p1 = scmp.ge.s32.totalorder %s31_s12, 2  ;;  %p148_p2 = scmp.lt.s32.totalorder %s468_s11, 3 }
   0x5   : > { %s539_s12 = smov (%p33_p1, %s31_s12), 0  ;;  %p149_p3 = pnand %p391_p0, %p148_p2 }
   0x6   : > { %v203_v0 = vld [vmem:[%s534_s1] sm:$0xff] (!%p149_p3)  ;;  %v204_v1 = vld [vmem:[%s534_s1 + $0x8] sm:$0xff] (!%p149_p3)  ;;  %v205_v2 = vld [vmem:[%s534_s1 + $0x10] sm:$0xff] (!%p149_p3)  ;;  %v470_v3 = vmov (!%p149_p3), 0.0|0.0   ;;  %vm471_vm0 = vmmov (!%p149_p3), 0   ;;  %v472_v6 = vmov (!%p149_p3), 0.0  }
   0x7   : > { %152 = sbr.rel (%p149_p3) target bundleno = 231 (0xe7), region = 28  ;;  %413 = vmatprep.subr.bf16.mxu0 (!%p149_p3), %v470_v3  ;;  %v414_v4 = vpack.c.bf16 (!%p149_p3), %v204_v1, %v203_v0  ;;  %v206_v5 = vld [vmem:[%s534_s1 + $0x18] sm:$0xff] (!%p149_p3)  ;;  %410 = vmatprep.mubr.msk.f32.mxu0 (!%p149_p3), %vm471_vm0, %v472_v6  ;;  %p181_p4 = scmp.lt.s32.totalorder (!%p149_p3), %s460_s9, 1  ;;  %vm207_vm1 = vcmask (!%p149_p3), 261120   ;;  %vm281_vm2 = vcmask (!%p149_p3), 785408  }
   0x8   : > { %v417_v7 = vpack.c.bf16 (!%p149_p3), %v206_v5, %v205_v2 }
   0x9   : > { %415 = vmatpush3.bf16.msra.mxu0 (!%p149_p3), %v414_v4 }
   0xa   : > { %416 = vmatprep.subr.bf16.mxu0 (!%p149_p3), %v470_v3 }
   0xd   : > { %418 = vmatpush3.bf16.msra.mxu0 (!%p149_p3), %v417_v7 }
   0xe   : > { %s541_s9 = smov (!%p181_p4, %s460_s9), 1 }
   0xf   : > { %s392_s21 = sshll.u32 %s541_s9, 3 }
  0x10   : > { %s187_s24 = scalar_lea.vmem %s533_s0, %s392_s21  ;;  %s201_s27 = scalar_lea.vmem %s535_s2, %s392_s21 }
  0x11   : > { %v202_v8 = vld [vmem:[%s187_s24] sm:$0xff] }
  0x12   : > { %411 = vmatmul.mubr.msk.f32.vlgmr.msra.gmra.mrb[0].mxu0 %vm207_vm1, %v202_v8 }
  0xe5   : > { %v277_v9 = vpop.f32.mrb[0].mxu0 }
  0xe6   : > { %282 = vst.msk [vmem:[%s201_s27] sm:$0xff] %vm281_vm2, %v277_v9  ;;  %v412_v10 = vpop.f32.mrb[1].mxu0 }
  0xe7 PF: > { %s12_s11 = sadd.s32 1, %s468_s11   ;;  %s536_s9 = smov %s464_s10 }
  0xe8   : > { %p9_p5 = scmp.ge.s32.totalorder %s12_s11, 4   ;;  %s537_s10 = smov %s539_s12 }
  0xea   :  { %11 = sbr.rel (!%p9_p5) target bundleno = 2 (0x2), region = 61 }

// kernel: multi_head_self_attention.3
= control target key start
LH: loop header
LB: loop body
LE: loop exit
PB: predicated region body
PF: predicated region fallthrough
CT: control target
= control target key end

     0   :  { %9 = vsyncpa [#allocation6], 0  ;;  %s2122_s0 = inlined_call_operand.vmem [shape: f32[2,4,8,8], index: 0, kind: input, shape index: {}]   ;;  %s2123_s1 = inlined_call_operand.vmem [shape: f32[2,4,8,8], index: 1, kind: input, shape index: {}]   ;;  %s2124_s2 = inlined_call_operand.vmem [shape: f32[2,4,8,8], index: 2, kind: input, shape index: {}]   ;;  %s2125_s3 = inlined_call_operand.vmem [shape: f32[4,8,32], index: 3, kind: input, shape index: {}]   ;;  %s2126_s4 = inlined_call_operand.hbm [shape: f32[2,8,32], index: 4, kind: output, shape index: {}]  }
   0x1   :  { %11 = vsyncpa [#allocation6 + $0x1], 0  ;;  %s1861_s15 = smov 0   ;;  %s1863_s16 = smov 0  }
   0x2   :  { %s1865_s17 = smov 0   ;;  %s1867_s18 = smov 0  }
   0x3   :  { %s1869_s19 = smov 0   ;;  %s1871_s20 = smov 0  }
   0x4 LB: > { %s1547_s21 = sadd.s32 4294967295, %s1829_s20   ;;  %s1548_s22 = sadd.s32 4294967294, %s1829_s20   ;;  %s1829_s20 = sphi %s1871_s20, %s17_s20   ;;  %s1825_s19 = sphi %s1869_s19, %s2133_s19   ;;  %s1821_s18 = sphi %s1867_s18, %s2132_s18   ;;  %s1817_s17 = sphi %s1865_s17, %s2131_s17   ;;  %s1813_s16 = sphi %s1863_s16, %s2130_s16   ;;  %s1809_s15 = sphi %s1861_s15, %s2129_s15  }
   0x5   : > { %s36_s23 = sadd.s32 1, %s1825_s19  ;;  %s150_s24 = sadd.s32 1, %s1817_s17 }
   0x6   : > { %p38_p0 = scmp.ge.s32.totalorder %s36_s23, 2  ;;  %p160_p1 = scmp.ne.s32.totalorder %s1817_s17, %s1813_s16 }
   0x7   : > { %p161_p2 = scmp.eq.s32.totalorder %s1547_s21, 1  ;;  %p166_p3 = scmp.ne.s32.totalorder %s1813_s16, %s1809_s15 }
   0x8   : > { %s2135_s23 = smov (%p38_p0, %s36_s23), 0  ;;  %p167_p5 = scmp.eq.s32.totalorder %s1548_s22, 1 }
   0x9   : > { %p1901_p4 = por %p161_p2, %p160_p1  ;;  %s145_s26 = ssub.s32 %s1825_s19, %s2135_s23 }
   0xa   : > { %p1551_p6 = scmp.ge.s32.totalorder %s1829_s20, 1  ;;  %p148_p7 = scmp.eq.s32.totalorder %s145_s26, 0 }
   0xb   : > { %p1908_p8 = por %p167_p5, %p166_p3  ;;  %p221_p9 = scmp.lt.s32.totalorder %s1829_s20, 3 }
   0xc   : > { %s1914_s28 = scalar_select %p148_p7, %s1817_s17, %s150_s24  }
   0xd   : > { %p222_p10 = pnand %p1551_p6, %p221_p9 }
   0xe   : > { %p266_p11 = scmp.lt.s32.totalorder (!%p222_p10), %s1821_s18, 1  ;;  %vm303_vm0 = vcmask (!%p222_p10), 64512   ;;  %v1831_v0 = vmov (!%p222_p10), 0.0   ;;  %vm1832_vm1 = vmmov (!%p222_p10), 0   ;;  %vm294_vm2 = vcmask (!%p222_p10), 7168   ;;  %s263_s6 = sand.u32 (!%p222_p10), 1, %s1813_s16  }
   0xf   : > { %225 = sbr.rel (%p222_p10) target bundleno = 1066 (0x42a), region = 36  ;;  %1606 = vmatprep.subr.mxu0 (!%p222_p10), %v1831_v0  ;;  %304 = vst.msk [vmem:[#allocation4] sm:$0xff] (!%p222_p10), %vm303_vm0, %v1831_v0  ;;  %305 = vst.msk [vmem:[#allocation4 + $0x8] sm:$0xff] (!%p222_p10), %vm303_vm0, %v1831_v0  ;;  %1608 = vmatprep.mubr.msk.f32.mxu0 (!%p222_p10), %vm1832_vm1, %v1831_v0  ;;  %v1833_v9 = vmov (!%p222_p10), -1e+30   ;;  %v633_v10 = vlaneseq (!%p222_p10)  ;;  %v1834_v29 = vmov (!%p222_p10), 0  }
  0x10   : > { %306 = vst.msk [vmem:[#allocation4 + $0x10] sm:$0xff] (!%p222_p10), %vm303_vm0, %v1831_v0  ;;  %307 = vst.msk [vmem:[#allocation4 + $0x18] sm:$0xff] (!%p222_p10), %vm303_vm0, %v1831_v0  ;;  %1611 = vmatprep.subr.mxu1 (!%p222_p10), %v1831_v0  ;;  %1613 = vmatprep.mubr.msk.f32.mxu1 (!%p222_p10), %vm1832_vm1, %v1831_v0  ;;  %vm1410_vm4 = vcmask (!%p222_p10), 261120   ;;  %s1576_s8 = sshll.u32 (!%p222_p10), %s1821_s18, 7  ;;  %s1835_s21 = smov (!%p222_p10), [#allocation5]  }
  0x11   : > { %295 = vst.msk [vmem:[#allocation2] sm:$0xff] (!%p222_p10), %vm294_vm2, %v1833_v9  ;;  %296 = vst.msk [vmem:[#allocation2 + $0x8] sm:$0xff] (!%p222_p10), %vm294_vm2, %v1833_v9  ;;  %v634_v11 = vshrl.u32 (!%p222_p10), %v633_v10, 7  ;;  %v639_v12 = vand.u32 (!%p222_p10), 127, %v633_v10  ;;  %1725 = vset.pattern.permute.xlu0 (!%p222_p10), %v1834_v29  ;;  %1726 = vset.pattern.permute.xlu1 (!%p222_p10), %v1834_v29  ;;  %s1755_s22 = sshll.u32 (!%p222_p10), %s1835_s21, 4  ;;  %s1756_s22 = int_to_ptr.vmem [resolvable:$false] %s1755_s22 }
  0x12   : > { %297 = vst.msk [vmem:[#allocation2 + $0x10] sm:$0xff] (!%p222_p10), %vm294_vm2, %v1833_v9  ;;  %298 = vst.msk [vmem:[#allocation2 + $0x18] sm:$0xff] (!%p222_p10), %vm294_vm2, %v1833_v9  ;;  %s1757_s24 = scalar_lea.vmem (!%p222_p10), %s1756_s22, 256 }
  0x13   : > { %299 = vst.msk [vmem:[#allocation3] sm:$0xff] (!%p222_p10), %vm294_vm2, %v1831_v0  ;;  %300 = vst.msk [vmem:[#allocation3 + $0x8] sm:$0xff] (!%p222_p10), %vm294_vm2, %v1831_v0  ;;  %vm642_vm3 = vcmp.ge.s32.totalorder (!%p222_p10), %v634_v11, %v639_v12 }
  0x14   : > { %301 = vst.msk [vmem:[#allocation3 + $0x10] sm:$0xff] (!%p222_p10), %vm294_vm2, %v1831_v0  ;;  %302 = vst.msk [vmem:[#allocation3 + $0x18] sm:$0xff] (!%p222_p10), %vm294_vm2, %v1831_v0 }
  0x16   : > { %s267_s29 = scalar_select %p266_p11, %s1821_s18, 1 }
  0x17   : > { %s1420_s18 = scalar_lea.sflag [#allocation6], %s263_s6 }
  0x18   : > { %s1932_s30 = sshll.u32 %s267_s29, 5  ;;  %v1978_v30 = vld [vmem:[#allocation2] sm:$0xff]  ;;  %v1983_v33 = vld [vmem:[#allocation2 + $0x8] sm:$0xff] }
  0x19   : > { %s281_s7 = scalar_lea.vmem %s2123_s1, %s1932_s30  ;;  %s273_s10 = scalar_lea.vmem %s2122_s0, %s1932_s30  ;;  %v1985_v34 = vld [vmem:[#allocation2 + $0x10] sm:$0xff]  ;;  %v1996_v40 = vld [vmem:[#allocation2 + $0x18] sm:$0xff] }
  0x1a   : > { %v320_v1 = vld [vmem:[%s281_s7] sm:$0xff]  ;;  %v321_v2 = vld [vmem:[%s281_s7 + $0x8] sm:$0xff]  ;;  %v322_v5 = vld [vmem:[%s281_s7 + $0x10] sm:$0xff]  ;;  %s289_s13 = scalar_lea.vmem %s2124_s2, %s1932_s30 }
  0x1b   : > { %1607 = vmatpush3.xpose.msk.msra.mxu0 %vm303_vm0, %v320_v1  ;;  %v316_v3 = vld [vmem:[%s273_s10] sm:$0xff]  ;;  %1612 = vmatpush3.xpose.msk.msra.mxu1 %vm303_vm0, %v321_v2  ;;  %v317_v4 = vld [vmem:[%s273_s10 + $0x8] sm:$0xff]  ;;  %v323_v6 = vld [vmem:[%s281_s7 + $0x18] sm:$0xff]  ;;  %s1552_s7 = sshll.u32 %s263_s6, 3 }
  0x1c   : > { %1616 = vmatprep.subr.mxu0 %v1831_v0  ;;  %1621 = vmatprep.subr.mxu1 %v1831_v0  ;;  %v318_v7 = vld [vmem:[%s273_s10 + $0x10] sm:$0xff]  ;;  %v319_v8 = vld [vmem:[%s273_s10 + $0x18] sm:$0xff]  ;;  %v324_v46 = vld [vmem:[%s289_s13] sm:$0xff]  ;;  %s265_s9 = scalar_lea.vmem [#allocation5], %s1552_s7 }
  0x1d   : > { %v325_v47 = vld [vmem:[%s289_s13 + $0x8] sm:$0xff]  ;;  %v326_v59 = vld [vmem:[%s289_s13 + $0x10] sm:$0xff]  ;;  %v327_v63 = vld [vmem:[%s289_s13 + $0x18] sm:$0xff]  ;;  %s1434_s10 = sshll.u32 %s265_s9, 4  ;;  %s2074_s13 = scalar_lea.hbm %s2126_s4, %s1576_s8  ;;  %s2076_s10 = int_to_ptr.vmem [resolvable:$true] %s1434_s10 }
  0x1e   : > { %1609 = vmatmul.mubr.msk.f32.vlgmr.msra.gmra.mrb[0].mxu0 %vm303_vm0, %v316_v3  ;;  %1614 = vmatmul.mubr.msk.f32.vlgmr.msra.gmra.mrb[0].mxu1 %vm303_vm0, %v317_v4  ;;  %s1751_s14 = scalar_lea.vmem %s2076_s10, 128  ;;  %p1758_p1 = scmp.lt.s32.totalorder %s2076_s10, %s1756_s22 }
  0x1f   : > { %1617 = vmatpush3.xpose.msk.msra.mxu0 %vm303_vm0, %v322_v5  ;;  %1618 = vmatprep.mubr.msk.f32.mxu0 %vm1832_vm1, %v1831_v0  ;;  %p1752_p12 = scmp.ne.s32.totalorder %s2076_s10, %s1751_s14  ;;  %p1759_p2 = scmp.lt.s32.totalorder %s1757_s24, %s1751_s14 }
  0x20   : > { %1622 = vmatpush3.xpose.msk.msra.mxu1 %vm303_vm0, %v323_v6  ;;  %1623 = vmatprep.mubr.msk.f32.mxu1 %vm1832_vm1, %v1831_v0 }
  0x21   : > { %1626 = vmatprep.subr.mxu0 %v1831_v0  ;;  %1631 = vmatprep.subr.mxu1 %v1831_v0  ;;  %p1753_p13 = pnand %p1752_p12, %p1901_p4  ;;  %p1760_p3 = por %p1759_p2, %p1758_p1 }
  0x22   : > { %1619 = vmatmul.mubr.msk.f32.vlgmr.msra.gmra.mrb[2].mxu0 %vm303_vm0, %v318_v7 }
  0x23   : > { %1624 = vmatmul.mubr.msk.f32.vlgmr.msra.gmra.mrb[2].mxu1 %vm303_vm0, %v319_v8  ;;  %1628 = vmatprep.mubr.msk.f32.mxu0 %vm1832_vm1, %v1831_v0  ;;  %p1754_p0 = pneg %p1753_p13 }
  0x24   : > { %1633 = vmatprep.mubr.msk.f32.mxu1 %vm1832_vm1, %v1831_v0  ;;  %1627 = vmatpush3.msra.mxu0 %v324_v46 }
  0x25   : > { %1636 = vmatprep.subr.mxu0 %v1831_v0  ;;  %1632 = vmatpush3.msra.mxu1 %v325_v47  ;;  %p1761_p5 = pnand %p1760_p3, %p1754_p0 }
  0x26   : > { %1641 = vmatprep.subr.mxu1 %v1831_v0 }
  0xf1   : > { %v401_v13 = vpop.f32.mrb[0].mxu0  ;;  %v477_v14 = vpop.f32.mrb[0].mxu1 }
  0xf2   : > { %v645_v15 = vsel %vm642_vm3, %v401_v13, -1e+30  ;;  %v1610_v16 = vpop.f32.mrb[1].mxu0  ;;  %v646_v17 = vsel %vm642_vm3, %v477_v14, -1e+30  ;;  %v1615_v18 = vpop.f32.mrb[1].mxu1 }
  0xf3   : > { %v653_v19 = vsel %vm303_vm0, %v645_v15, -inf  ;;  %v656_v20 = vsel %vm303_vm0, %v646_v17, -inf  ;;  %v714_v18 = vld [vmem:[#allocation3 + $0x8] sm:$0xff] }
  0xf4   : > { %654 = vmax.xlane.f32.xlu0 %v653_v19 }
  0xf5   : > { %v553_v21 = vpop.f32.mrb[2].mxu0 }
  0xf6   : > { %v647_v22 = vsel %vm642_vm3, %v553_v21, -1e+30  ;;  %v1620_v23 = vpop.f32.mrb[3].mxu0  ;;  %v629_v24 = vpop.f32.mrb[2].mxu1 }
  0xf7   : > { %v648_v25 = vsel %vm642_vm3, %v629_v24, -1e+30  ;;  %v659_v26 = vsel %vm303_vm0, %v647_v22, -inf  ;;  %v1625_v27 = vpop.f32.mrb[3].mxu1 }
  0xf8   : > { %657 = vmax.xlane.f32.xlu0 %v656_v20  ;;  %660 = vmax.xlane.f32.xlu1 %v659_v26  ;;  %v662_v28 = vsel %vm303_vm0, %v648_v25, -inf  ;;  %v716_v26 = vld [vmem:[#allocation3 + $0x18] sm:$0xff] }
  0xfc   : > { %663 = vmax.xlane.f32.xlu1 %v662_v28 }
 0x181   : > { %v655_v31 = vpop.xlane.xlu0 %654 }
 0x182   : > { %v1981_v32 = vmax.f32 %v1978_v30, %v655_v31 }
 0x184   : > { %v669_v35 = vsub.f32 %v1978_v30, %v1981_v32  ;;  %1070 = vst.msk [vmem:[#allocation2] sm:$0xff] %vm294_vm2, %v1981_v32  ;;  %683 = vperm.xlu0 %1725, %v1981_v32  }
 0x185   : > { %v658_v36 = vpop.xlane.xlu0 %657  ;;  %v661_v37 = vpop.xlane.xlu1 %660 }
 0x186   : > { %v666_v38 = vmax.f32 %v1983_v33, %v658_v36  ;;  %v1994_v39 = vmax.f32 %v1985_v34, %v661_v37  ;;  %v673_v8 = vmul.f32 1.442695, %v669_v35  ;;  %v1113_v36 = vld [vmem:[%s2125_s3] sm:$0xff] }
 0x188   : > { %v670_v41 = vsub.f32 %v1983_v33, %v666_v38  ;;  %1071 = vst.msk [vmem:[#allocation2 + $0x8] sm:$0xff] %vm294_vm2, %v666_v38  ;;  %688 = vperm.xlu1 %1726, %v666_v38   ;;  %v671_v42 = vsub.f32 %v1985_v34, %v1994_v39  ;;  %1072 = vst.msk [vmem:[#allocation2 + $0x10] sm:$0xff] %vm294_vm2, %v1994_v39  ;;  %v1114_v38 = vld [vmem:[%s2125_s3 + $0x8] sm:$0xff] }
 0x189   : > { %v664_v43 = vpop.xlane.xlu1 %663 }
 0x18a   : > { %v668_v44 = vmax.f32 %v1996_v40, %v664_v43  ;;  %v675_v6 = vmul.f32 1.442695, %v670_v41  ;;  %v677_v9 = vmul.f32 1.442695, %v671_v42  ;;  %v1034_v41 = vld [vmem:[#allocation4] sm:$0xff] }
 0x18c   : > { %693 = vperm.xlu1 %1726, %v1994_v39   ;;  %v672_v45 = vsub.f32 %v1996_v40, %v668_v44  ;;  %1073 = vst.msk [vmem:[#allocation2 + $0x18] sm:$0xff] %vm294_vm2, %v668_v44 }
 0x18e   : > { %v679_v10 = vmul.f32 1.442695, %v672_v45 }
 0x190   : > { %698 = vperm.xlu1 %1726, %v668_v44   ;;  %v1035_v44 = vld [vmem:[#allocation4 + $0x8] sm:$0xff] }
 0x203   : > { %v684_v48 = vpop.permute.xlu0 %683 }
 0x204   : > { %v701_v49 = vsub.f32 %v645_v15, %v684_v48  ;;  %v713_v15 = vld [vmem:[#allocation3] sm:$0xff] }
 0x206   : > { %v705_v50 = vmul.f32 1.442695, %v701_v49 }
 0x207   : > { %v689_v51 = vpop.permute.xlu1 %688 }
 0x208   : > { %1727 = vpow2.f32 %v705_v50  ;;  %v702_v52 = vsub.f32 %v646_v17, %v689_v51  ;;  %v1036_v51 = vld [vmem:[#allocation4 + $0x10] sm:$0xff] }
 0x20a   : > { %v707_v53 = vmul.f32 1.442695, %v702_v52 }
 0x20b   : > { %v694_v54 = vpop.permute.xlu1 %693 }
 0x20c   : > { %1729 = vpow2.f32 %v707_v53  ;;  %v703_v55 = vsub.f32 %v647_v22, %v694_v54  ;;  %v715_v22 = vld [vmem:[#allocation3 + $0x10] sm:$0xff] }
 0x20e   : > { %v709_v56 = vmul.f32 1.442695, %v703_v55 }
 0x20f   : > { %v699_v57 = vpop.permute.xlu1 %698 }
 0x210   : > { %1731 = vpow2.f32 %v709_v56  ;;  %v704_v58 = vsub.f32 %v648_v25, %v699_v57  ;;  %v1037_v56 = vld [vmem:[#allocation4 + $0x18] sm:$0xff] }
 0x212   : > { %v1728_v60 = vpop.eup %1727  ;;  %v711_v61 = vmul.f32 1.442695, %v704_v58 }
 0x213   : > { %1629 = vmatmul.mubr.msk.f32.vlgmr.msra.gmra.mrb[4].mxu0 %vm303_vm0, %v1728_v60  ;;  %v721_v62 = vsel %vm303_vm0, %v1728_v60, 0.0 }
 0x214   : > { %1733 = vpow2.f32 %v711_v61  ;;  %722 = vadd.xlane.f32.xlu1 %v721_v62  ;;  %1637 = vmatpush3.msra.mxu0 %v326_v59 }
 0x215   : > { %1638 = vmatprep.mubr.msk.f32.mxu0 %vm1832_vm1, %v1831_v0  ;;  %1646 = vmatprep.subr.mxu0 %v1831_v0  ;;  %1735 = vpow2.f32 %v675_v6 }
 0x216   : > { %v1730_v1 = vpop.eup %1729  ;;  %1737 = vpow2.f32 %v673_v8 }
 0x217   : > { %1634 = vmatmul.mubr.msk.f32.vlgmr.msra.gmra.mrb[4].mxu1 %vm303_vm0, %v1730_v1  ;;  %v724_v2 = vsel %vm303_vm0, %v1730_v1, 0.0  ;;  %1739 = vpow2.f32 %v677_v9  ;;  %v1116_v9 = vld [vmem:[%s2125_s3 + $0x18] sm:$0xff] }
 0x218   : > { %725 = vadd.xlane.f32.xlu0 %v724_v2  ;;  %1642 = vmatpush3.msra.mxu1 %v327_v63  ;;  %1741 = vpow2.f32 %v679_v10 }
 0x219   : > { %1643 = vmatprep.mubr.msk.f32.mxu1 %vm1832_vm1, %v1831_v0  ;;  %1651 = vmatprep.subr.mxu1 %v1831_v0 }
 0x21a   : > { %v1732_v3 = vpop.eup %1731 }
 0x21b   : > { %1639 = vmatmul.mubr.msk.f32.vlgmr.msra.gmra.mrb[6].mxu0 %vm303_vm0, %v1732_v3  ;;  %v727_v4 = vsel %vm303_vm0, %v1732_v3, 0.0 }
 0x21c   : > { %728 = vadd.xlane.f32.xlu1 %v727_v4  ;;  %1648 = vmatprep.mubr.msk.f32.mxu0 %vm1832_vm1, %v1831_v0 }
 0x21d   : > { %1647 = vmatpush3.msra.mxu0 %v1113_v36 }
 0x21e   : > { %v1734_v5 = vpop.eup %1733  ;;  %1656 = vmatprep.subr.mxu0 %v1831_v0 }
 0x21f   : > { %1644 = vmatmul.mubr.msk.f32.vlgmr.msra.gmra.mrb[6].mxu1 %vm303_vm0, %v1734_v5  ;;  %v730_v7 = vsel %vm303_vm0, %v1734_v5, 0.0  ;;  %v1736_v11 = vpop.eup %1735  ;;  %v1115_v5 = vld [vmem:[%s2125_s3 + $0x10] sm:$0xff] }
 0x220   : > { %731 = vadd.xlane.f32.xlu1 %v730_v7  ;;  %1653 = vmatprep.mubr.msk.f32.mxu1 %vm1832_vm1, %v1831_v0  ;;  %v1738_v12 = vpop.eup %1737  ;;  %v718_v20 = vmul.f32 %v1736_v11, %v714_v18 }
 0x221   : > { %v1740_v13 = vpop.eup %1739  ;;  %v717_v16 = vmul.f32 %v1738_v12, %v713_v15  ;;  %1652 = vmatpush3.msra.mxu1 %v1114_v38 }
 0x222   : > { %v1742_v14 = vpop.eup %1741  ;;  %v719_v24 = vmul.f32 %v1740_v13, %v715_v22  ;;  %1661 = vmatprep.subr.mxu1 %v1831_v0 }
 0x223   : > { %v720_v29 = vmul.f32 %v1742_v14, %v716_v26 }
 0x22e   : > { %1045 = vperm.xlu0 %1725, %v1736_v11  }
 0x231   : > { %1040 = vperm.xlu1 %1726, %v1738_v12  }
 0x235   : > { %1050 = vperm.xlu1 %1726, %v1740_v13  }
 0x239   : > { %1055 = vperm.xlu1 %1726, %v1742_v14  }
 0x2a1   : > { %v723_v17 = vpop.xlane.xlu1 %722 }
 0x2a2   : > { %v733_v19 = vadd.f32 %v723_v17, %v717_v16 }
 0x2a4   : > { %738 = vst.msk [vmem:[#allocation3] sm:$0xff] %vm294_vm2, %v733_v19 }
 0x2a5   : > { %v726_v21 = vpop.xlane.xlu0 %725 }
 0x2a6   : > { %v734_v23 = vadd.f32 %v726_v21, %v718_v20 }
 0x2a8   : > { %739 = vst.msk [vmem:[#allocation3 + $0x8] sm:$0xff] %vm294_vm2, %v734_v23 }
 0x2a9   : > { %v729_v25 = vpop.xlane.xlu1 %728 }
 0x2aa   : > { %v735_v27 = vadd.f32 %v729_v25, %v719_v24 }
 0x2ab   : > { %v1077_v28 = vld [vmem:[#allocation3] sm:$0xff] }
 0x2ac   : > { %740 = vst.msk [vmem:[#allocation3 + $0x10] sm:$0xff] %vm294_vm2, %v735_v27  ;;  %1743 = vrcp.f32 %v1077_v28 }
 0x2ad   : > { %v732_v30 = vpop.xlane.xlu1 %731  ;;  %v1046_v45 = vpop.permute.xlu0 %1045 }
 0x2ae   : > { %v736_v31 = vadd.f32 %v732_v30, %v720_v29  ;;  %v1059_v50 = vmul.f32 %v1046_v45, %v1035_v44 }
 0x2af   : > { %v1078_v32 = vld [vmem:[#allocation3 + $0x8] sm:$0xff] }
 0x2b0   : > { %741 = vst.msk [vmem:[#allocation3 + $0x18] sm:$0xff] %vm294_vm2, %v736_v31  ;;  %1745 = vrcp.f32 %v1078_v32 }
 0x2b1   : > { %v1041_v42 = vpop.permute.xlu1 %1040 }
 0x2b2   : > { %v1058_v43 = vmul.f32 %v1041_v42, %v1034_v41 }
 0x2b3   : > { %v1079_v33 = vld [vmem:[#allocation3 + $0x10] sm:$0xff] }
 0x2b4   : > { %1747 = vrcp.f32 %v1079_v33 }
 0x2b5   : > { %v1051_v49 = vpop.permute.xlu1 %1050 }
 0x2b6   : > { %v1744_v34 = vpop.eup %1743  ;;  %v1060_v55 = vmul.f32 %v1051_v49, %v1036_v51 }
 0x2b7   : > { %1091 = vperm.xlu1 %1726, %v1744_v34   ;;  %v1080_v35 = vld [vmem:[#allocation3 + $0x18] sm:$0xff] }
 0x2b8   : > { %1749 = vrcp.f32 %v1080_v35 }
 0x2b9   : > { %v1056_v57 = vpop.permute.xlu1 %1055 }
 0x2ba   : > { %v1746_v37 = vpop.eup %1745  ;;  %v1061_v61 = vmul.f32 %v1056_v57, %v1037_v56 }
 0x2bb   : > { %1096 = vperm.xlu0 %1725, %v1746_v37  }
 0x2be   : > { %v1748_v39 = vpop.eup %1747 }
 0x2bf   : > { %1101 = vperm.xlu1 %1726, %v1748_v39  }
 0x2c2   : > { %v1750_v40 = vpop.eup %1749 }
 0x2c3   : > { %1106 = vperm.xlu0 %1725, %v1750_v40  }
 0x2e6   : > { %v811_v46 = vpop.f32.mrb[4].mxu0 }
 0x2e7   : > { %v1062_v47 = vadd.f32 %v1058_v43, %v811_v46  ;;  %v1630_v48 = vpop.f32.mrb[5].mxu0 }
 0x2e9   : > { %1066 = vst.msk [vmem:[#allocation4] sm:$0xff] %vm303_vm0, %v1062_v47 }
 0x2ea   : > { %v884_v52 = vpop.f32.mrb[4].mxu1 }
 0x2eb   : > { %v1063_v53 = vadd.f32 %v1059_v50, %v884_v52  ;;  %v1635_v54 = vpop.f32.mrb[5].mxu1 }
 0x2ed   : > { %1067 = vst.msk [vmem:[#allocation4 + $0x8] sm:$0xff] %vm303_vm0, %v1063_v53 }
 0x2ee   : > { %v957_v58 = vpop.f32.mrb[6].mxu0 }
 0x2ef   : > { %v1064_v59 = vadd.f32 %v1060_v55, %v957_v58  ;;  %v1640_v60 = vpop.f32.mrb[7].mxu0 }
 0x2f0   : > { %v1085_v3 = vld [vmem:[#allocation4] sm:$0xff] }
 0x2f1   : > { %1068 = vst.msk [vmem:[#allocation4 + $0x10] sm:$0xff] %vm303_vm0, %v1064_v59 }
 0x2f2   : > { %v1030_v62 = vpop.f32.mrb[6].mxu1 }
 0x2f3   : > { %v1065_v63 = vadd.f32 %v1061_v61, %v1030_v62  ;;  %v1645_v1 = vpop.f32.mrb[7].mxu1 }
 0x2f4   : > { %v1086_v6 = vld [vmem:[#allocation4 + $0x8] sm:$0xff] }
 0x2f5   : > { %1069 = vst.msk [vmem:[#allocation4 + $0x18] sm:$0xff] %vm303_vm0, %v1065_v63 }
 0x2f8   : > { %v1087_v11 = vld [vmem:[#allocation4 + $0x10] sm:$0xff] }
 0x2fc   : > { %v1088_v14 = vld [vmem:[#allocation4 + $0x18] sm:$0xff] }
 0x336   : > { %v1092_v2 = vpop.permute.xlu1 %1091 }
 0x337   : > { %v1109_v4 = vmul.f32 %v1092_v2, %v1085_v3 }
 0x339   : > { %1649 = vmatmul.mubr.msk.f32.vlgmr.msra.gmra.mrb[8].mxu0 %vm303_vm0, %v1109_v4 }
 0x33a   : > { %v1097_v7 = vpop.permute.xlu0 %1096  ;;  %1657 = vmatpush3.msra.mxu0 %v1115_v5  ;;  %1658 = vmatprep.mubr.msk.f32.mxu0 %vm1832_vm1, %v1831_v0 }
 0x33b   : > { %v1110_v8 = vmul.f32 %v1097_v7, %v1086_v6 }
 0x33d   : > { %1654 = vmatmul.mubr.msk.f32.vlgmr.msra.gmra.mrb[8].mxu1 %vm303_vm0, %v1110_v8 }
 0x33e   : > { %v1102_v10 = vpop.permute.xlu1 %1101  ;;  %1662 = vmatpush3.msra.mxu1 %v1116_v9  ;;  %1663 = vmatprep.mubr.msk.f32.mxu1 %vm1832_vm1, %v1831_v0 }
 0x33f   : > { %v1111_v12 = vmul.f32 %v1102_v10, %v1087_v11 }
 0x341   : > { %1659 = vmatmul.mubr.msk.f32.vlgmr.msra.gmra.mrb[10].mxu0 %vm303_vm0, %v1111_v12 }
 0x342   : > { %v1107_v13 = vpop.permute.xlu0 %1106 }
 0x343   : > { %v1112_v15 = vmul.f32 %v1107_v13, %v1088_v14 }
 0x345   : > { %1664 = vmatmul.mubr.msk.f32.vlgmr.msra.gmra.mrb[10].mxu1 %vm303_vm0, %v1112_v15 }
 0x40c   : > { %v1187_v16 = vpop.f32.mrb[8].mxu0 }
 0x40d   : > { %v1650_v17 = vpop.f32.mrb[9].mxu0  ;;  %v1411_v19 = vsel %vm1410_vm4, %v1187_v16, 0.0 }
 0x410   : > { %v1260_v18 = vpop.f32.mrb[8].mxu1 }
 0x411   : > { %v1412_v20 = vsel %vm1410_vm4, %v1260_v18, 0.0  ;;  %v1655_v21 = vpop.f32.mrb[9].mxu1 }
 0x412   : > { %v1413_v0 = vadd.f32 %v1412_v20, %v1411_v19 }
 0x414   : > { %v1333_v22 = vpop.f32.mrb[10].mxu0 }
 0x415   : > { %v1414_v23 = vsel %vm1410_vm4, %v1333_v22, 0.0  ;;  %v1660_v24 = vpop.f32.mrb[11].mxu0 }
 0x416   : > { %v1415_v25 = vadd.f32 %v1414_v23, %v1413_v0 }
 0x418   : > { %v1406_v26 = vpop.f32.mrb[10].mxu1 }
 0x419   : > { %v1416_v27 = vsel %vm1410_vm4, %v1406_v26, 0.0  ;;  %v1665_v28 = vpop.f32.mrb[11].mxu1 }
 0x41a   : > { %v1417_v29 = vadd.f32 %v1416_v27, %v1415_v25 }
 0x41c   : > { %1418 = vst.msk [vmem:[%s265_s9] sm:$0xff] %vm1410_vm4, %v1417_v29 }
 0x41d   : > { %1764 = shalt.err (!%p1761_p5)
}
 0x41e   : > { %s1765_s26 = scalar_lea.hbm %s2074_s13, 128  ;;  %s1769_s5 = scalar_lea.hbm %s2126_s4, 256 }
 0x41f   : > { %p1766_p6 = scmp.ne.s32.totalorder %s2074_s13, %s1765_s26  ;;  %p1770_p10 = scmp.lt.u32.totalorder %s2074_s13, %s2126_s4 }
 0x420   : > { %p1771_p11 = scmp.lt.u32.totalorder %s1769_s5, %s1765_s26  ;;  %p1773_p13 = scmp.lt.u32.totalorder %s1765_s26, %s2074_s13 }
 0x421   : > { %p1767_p7 = pnand %p1766_p6, %p1901_p4 }
 0x422   : > { %p1772_p12 = por %p1771_p11, %p1770_p10 }
 0x423   : > { %p1768_p9 = pneg %p1767_p7 }
 0x424   : > { %p1774_p0 = por %p1773_p13, %p1772_p12 }
 0x426   : > { %p1775_p1 = pnand %p1774_p0, %p1768_p9 }
 0x428   : > { %1778 = shalt.err (!%p1775_p1)
}
 0x429   : > { %1666 = dma.vmem_to_hbm [thread:$0]  (%p1901_p4), %s2076_s10, 128, %s2074_s13, %s1420_s18  }
 0x42a PF: > { %p1672_p2 = scmp.ge.s32.totalorder %s1829_s20, 2  ;;  %s1446_s8 = sand.u32 1, %s1809_s15  }
 0x42b   : > { %s1447_s9 = scalar_lea.sflag [#allocation6], %s1446_s8 }
 0x42c   : > { %p1669_p3 = pnand %p1672_p2, %p1908_p8 }
 0x42e   : > { %1804 = dma.done.wait (!%p1669_p3), %s1447_s9, 128  }
 0x42f   : > { %1806 = vsyncadd (!%p1669_p3), %s1447_s9, 4294967168  ;;  %s17_s20 = sadd.s32 1, %s1829_s20   ;;  %s2129_s15 = smov %s1813_s16 }
 0x430   : > { %p14_p5 = scmp.ge.s32.totalorder %s17_s20, 4   ;;  %s2130_s16 = smov %s1817_s17 }
 0x431   : > { %s2131_s17 = smov %s1914_s28  ;;  %s2132_s18 = smov %s1825_s19 }
 0x432   : > { %s2133_s19 = smov %s2135_s23  ;;  %16 = sbr.rel (!%p14_p5) target bundleno = 4 (0x4), region = 89 }
 0x439   :  { %1452 = vsyncpa [#allocation6], 1 }
 0x43a   :  { %1454 = vsyncpa [#allocation6 + $0x1], 1 }

</bundles_post_ra>
